<compile_context>
chip_gen: v6e
topology: v6e:2x2x1
jax: 0.10.0
libtpu: 0.0.40
codegen_flags: <defaults>
</compile_context>

<pallas_src>
import functools
import numpy as np
import jax
import jax.numpy as jnp
from jax.experimental import pallas as pl
from jax.experimental.pallas import tpu as pltpu


# ----------------------------------------------------------------------------
# MXU matmul (bf16 operands, f32 accumulation)
# ----------------------------------------------------------------------------

_MATMUL_VMEM_LIMIT = 32 * 1024 * 1024    # safe on v5e/v6e (128 MiB) and v7x (64 MiB)
_SINGLE_BLOCK_BUDGET = 20 * 1024 * 1024  # A + B + f32 out resident bytes


def _rup(x, m):
    return (x + m - 1) // m * m


def _matmul_single_kernel(a_ref, b_ref, o_ref):
    o_ref[...] = jnp.dot(a_ref[...], b_ref[...],
                         preferred_element_type=jnp.float32)


def _matmul_grid_kernel(a_ref, b_ref, o_ref):
    @pl.when(pl.program_id(2) == 0)
    def _():
        o_ref[...] = jnp.zeros_like(o_ref)

    o_ref[...] += jnp.dot(a_ref[...], b_ref[...],
                          preferred_element_type=jnp.float32)


def _pick_m(M):
    if M <= 256:
        return M, M
    if M % 256 == 0:
        return 256, M
    if M % 128 == 0:
        return 128, M
    for c in (64, 32, 16, 8):
        if M % c == 0:
            return c, M
    return 128, _rup(M, 128)


def _pick_n(N):
    if N <= 512:
        return N, N
    if N % 512 == 0:
        return 512, N
    if N % 256 == 0:
        return 256, N
    if N % 128 == 0:
        return 128, N
    return 128, _rup(N, 128)


def _pick_k(K):
    if K <= 2048:
        return K, K
    for c in (2048, 1536, 1152, 1024, 768, 640, 512, 384, 256, 128):
        if K % c == 0:
            return c, K
    return 512, _rup(K, 512)


def pallas_matmul(a, b):
    """a: (M, K), b: (K, N) -> (M, N) f32. Operands cast to bf16, f32 acc."""
    M, K = a.shape
    K2, N = b.shape
    assert K == K2
    a = a.astype(jnp.bfloat16)
    b = b.astype(jnp.bfloat16)

    if N < 16:
        # Degenerate lane width (e.g. the final 64->1 projection): a Pallas
        # output this narrow would be all masked partial stores; XLA does it.
        return jnp.dot(a, b, preferred_element_type=jnp.float32)

    footprint = (M * K + K * N) * 2 + M * N * 4
    if footprint <= _SINGLE_BLOCK_BUDGET:
        # Whole-problem single invocation: removes per-grid-step overhead and
        # gives lane-dense full-width output stores.  Megacore split skipped
        # on purpose: these tiny-M matmuls are overhead-dominated.
        return pl.pallas_call(
            _matmul_single_kernel,
            out_shape=jax.ShapeDtypeStruct((M, N), jnp.float32),
            compiler_params=pltpu.CompilerParams(
                vmem_limit_bytes=_MATMUL_VMEM_LIMIT),
        )(a, b)

    # Gridded fallback (not exercised at this model's problem sizes).
    bm, Mp = _pick_m(M)
    bn, Np = _pick_n(N)
    bk, Kp = _pick_k(K)
    if (Mp, Kp) != (M, K):
        a = jnp.pad(a, ((0, Mp - M), (0, Kp - K)))
    if (Kp, Np) != (K, N):
        b = jnp.pad(b, ((0, Kp - K), (0, Np - N)))
    out = pl.pallas_call(
        _matmul_grid_kernel,
        out_shape=jax.ShapeDtypeStruct((Mp, Np), jnp.float32),
        grid_spec=pltpu.PrefetchScalarGridSpec(
            num_scalar_prefetch=0,
            grid=(Mp // bm, Np // bn, Kp // bk),
            in_specs=[pl.BlockSpec((bm, bk), lambda i, j, k: (i, k)),
                      pl.BlockSpec((bk, bn), lambda i, j, k: (k, j))],
            out_specs=pl.BlockSpec((bm, bn), lambda i, j, k: (i, j))),
        compiler_params=pltpu.CompilerParams(
            dimension_semantics=("parallel", "parallel", "arbitrary"),
            vmem_limit_bytes=_MATMUL_VMEM_LIMIT),
    )(a, b)
    if (Mp, Np) != (M, N):
        out = out[:M, :N]
    return out


# ----------------------------------------------------------------------------
# Fused BatchNorm (+ReLU) (+residual add + ReLU) Pallas kernels  (bf16 out)
# ----------------------------------------------------------------------------

_BN_EPS = 1e-5
_BN_SMALL_ELEMS = 1 << 20            # single-block path when M*C below this
_BN_VMEM_LIMIT = 32 * 1024 * 1024


def _bn_small_kernel(x_ref, g_ref, b_ref, o_ref, *, relu):
    x = x_ref[...]                                               # (M, C) f32
    mean = jnp.mean(x, axis=0, keepdims=True)
    var = jnp.mean(jnp.square(x - mean), axis=0, keepdims=True)  # biased
    y = (x - mean) * jax.lax.rsqrt(var + _BN_EPS) * g_ref[...] + b_ref[...]
    if relu:
        y = jnp.maximum(y, 0.0)
    o_ref[...] = y.astype(o_ref.dtype)


def _bn_small_res_kernel(x_ref, g_ref, b_ref, r_ref, o_ref, *, relu_before_add):
    x = x_ref[...]
    mean = jnp.mean(x, axis=0, keepdims=True)
    var = jnp.mean(jnp.square(x - mean), axis=0, keepdims=True)
    y = (x - mean) * jax.lax.rsqrt(var + _BN_EPS) * g_ref[...] + b_ref[...]
    if relu_before_add:
        y = jnp.maximum(y, 0.0)
    y = jnp.maximum(y + r_ref[...].astype(jnp.float32), 0.0)
    o_ref[...] = y.astype(o_ref.dtype)


def _bn_stats_kernel(x_ref, stat_ref):
    """Accumulate per-channel [sum; sumsq] across row tiles."""
    @pl.when(pl.program_id(0) == 0)
    def _():
        stat_ref[...] = jnp.zeros_like(stat_ref)

    x = x_ref[...]
    s = jnp.sum(x, axis=0, keepdims=True)
    ss = jnp.sum(x * x, axis=0, keepdims=True)
    stat_ref[...] += jnp.concatenate([s, ss], axis=0)            # (2, C)


def _bn_apply_kernel(x_ref, stat_ref, g_ref, b_ref, o_ref, *, count, relu):
    x = x_ref[...]
    st = stat_ref[...]
    mean = st[0:1, :] / count
    var = jnp.maximum(st[1:2, :] / count - mean * mean, 0.0)
    y = (x - mean) * jax.lax.rsqrt(var + _BN_EPS) * g_ref[...] + b_ref[...]
    if relu:
        y = jnp.maximum(y, 0.0)
    o_ref[...] = y.astype(o_ref.dtype)


def _bn_apply_res_kernel(x_ref, stat_ref, g_ref, b_ref, r_ref, o_ref, *,
                         count, relu_before_add):
    x = x_ref[...]
    st = stat_ref[...]
    mean = st[0:1, :] / count
    var = jnp.maximum(st[1:2, :] / count - mean * mean, 0.0)
    y = (x - mean) * jax.lax.rsqrt(var + _BN_EPS) * g_ref[...] + b_ref[...]
    if relu_before_add:
        y = jnp.maximum(y, 0.0)
    y = jnp.maximum(y + r_ref[...].astype(jnp.float32), 0.0)
    o_ref[...] = y.astype(o_ref.dtype)


def _pick_row_tile(M, C):
    """Row tile for gridded BN; ~4 MiB f32 x-block (better HBM roofline)."""
    limit = max(16, (1 << 20) // max(C, 1))
    for c in (2048, 1024, 512, 256, 128, 64, 32, 16):
        if c <= limit and M % c == 0:
            return c, M
    return 16, _rup(M, 16)


def _bn_gridded(x2, g2, b2, r2, relu, relu_before_add):
    """Two-pass gridded BN on (M, C): exact cross-tile stats, bounded VMEM."""
    M, C = x2.shape
    TR, Mp = _pick_row_tile(M, C)
    if Mp != M:   # zero rows contribute 0 to sum/sumsq; count uses true M
        x2 = jnp.pad(x2, ((0, Mp - M), (0, 0)))
        if r2 is not None:
            r2 = jnp.pad(r2, ((0, Mp - M), (0, 0)))
    grid = (Mp // TR,)
    row_spec = pl.BlockSpec((TR, C), lambda i: (i, 0))
    rep2 = pl.BlockSpec((2, C), lambda i: (0, 0))
    rep1 = pl.BlockSpec((1, C), lambda i: (0, 0))

    stats = pl.pallas_call(
        _bn_stats_kernel,
        out_shape=jax.ShapeDtypeStruct((2, C), jnp.float32),
        grid_spec=pltpu.PrefetchScalarGridSpec(
            num_scalar_prefetch=0, grid=grid,
            in_specs=[row_spec], out_specs=rep2),
        compiler_params=pltpu.CompilerParams(
            dimension_semantics=("arbitrary",),
            vmem_limit_bytes=_BN_VMEM_LIMIT),
    )(x2)

    count = float(M)
    if r2 is None:
        y = pl.pallas_call(
            functools.partial(_bn_apply_kernel, count=count, relu=relu),
            out_shape=jax.ShapeDtypeStruct((Mp, C), jnp.bfloat16),
            grid_spec=pltpu.PrefetchScalarGridSpec(
                num_scalar_prefetch=0, grid=grid,
                in_specs=[row_spec, rep2, rep1, rep1],
                out_specs=row_spec),
            compiler_params=pltpu.CompilerParams(
                dimension_semantics=("parallel",),
                vmem_limit_bytes=_BN_VMEM_LIMIT),
        )(x2, stats, g2, b2)
    else:
        y = pl.pallas_call(
            functools.partial(_bn_apply_res_kernel, count=count,
                              relu_before_add=relu_before_add),
            out_shape=jax.ShapeDtypeStruct((Mp, C), jnp.bfloat16),
            grid_spec=pltpu.PrefetchScalarGridSpec(
                num_scalar_prefetch=0, grid=grid,
                in_specs=[row_spec, rep2, rep1, rep1, row_spec],
                out_specs=row_spec),
            compiler_params=pltpu.CompilerParams(
                dimension_semantics=("parallel",),
                vmem_limit_bytes=_BN_VMEM_LIMIT),
        )(x2, stats, g2, b2, r2)
    return y[:M] if Mp != M else y


@functools.partial(jax.jit, static_argnames=("relu",))
def batchnorm_act(x, gamma, beta, *, relu=True):
    """Train-mode BatchNorm2d (+ optional ReLU) on NHWC activations (bf16 out)."""
    N, H, W, C = x.shape
    M = N * H * W
    x2 = x.reshape(M, C).astype(jnp.float32)
    g2 = gamma.reshape(1, C)
    b2 = beta.reshape(1, C)
    if M * C <= _BN_SMALL_ELEMS:
        y = pl.pallas_call(
            functools.partial(_bn_small_kernel, relu=relu),
            out_shape=jax.ShapeDtypeStruct((M, C), jnp.bfloat16),
            compiler_params=pltpu.CompilerParams(
                vmem_limit_bytes=_BN_VMEM_LIMIT),
        )(x2, g2, b2)
    else:
        y = _bn_gridded(x2, g2, b2, None, relu, False)
    return y.reshape(N, H, W, C)


@functools.partial(jax.jit, static_argnames=("relu_before_add",))
def batchnorm_add_relu(x, gamma, beta, residual, *, relu_before_add=False):
    """relu( maybe_relu(BN(x)) + residual ): fused BN + residual epilogue."""
    N, H, W, C = x.shape
    M = N * H * W
    x2 = x.reshape(M, C).astype(jnp.float32)
    r2 = residual.reshape(M, C).astype(jnp.bfloat16)
    g2 = gamma.reshape(1, C)
    b2 = beta.reshape(1, C)
    if M * C <= _BN_SMALL_ELEMS:
        y = pl.pallas_call(
            functools.partial(_bn_small_res_kernel,
                              relu_before_add=relu_before_add),
            out_shape=jax.ShapeDtypeStruct((M, C), jnp.bfloat16),
            compiler_params=pltpu.CompilerParams(
                vmem_limit_bytes=_BN_VMEM_LIMIT),
        )(x2, g2, b2, r2)
    else:
        y = _bn_gridded(x2, g2, b2, r2, True, relu_before_add)
    return y.reshape(N, H, W, C)


# ----------------------------------------------------------------------------
# Convolution / pooling helpers (glue fused by XLA, matmuls in Pallas)
# ----------------------------------------------------------------------------

@functools.partial(jax.jit, static_argnames=("k", "stride", "padding"))
def conv2d(x, wmat, *, k, stride=1, padding=0):
    """x: NHWC; wmat: pre-laid-out (k*k*Cin, Cout) bf16 in (kh, kw, c) order."""
    N, H, W, C = x.shape
    O = wmat.shape[1]
    xb = x.astype(jnp.bfloat16)
    if k == 1 and padding == 0:
        # 1x1 conv fast path: no im2col expansion at all.
        if stride != 1:
            xb = xb[:, ::stride, ::stride, :]
        _, OH, OW, _ = xb.shape
        out = pallas_matmul(xb.reshape(N * OH * OW, C), wmat)
        return out.reshape(N, OH, OW, O)
    xp = jnp.pad(xb, ((0, 0), (padding, padding), (padding, padding), (0, 0)))
    OH = (H + 2 * padding - k) // stride + 1
    OW = (W + 2 * padding - k) // stride + 1
    # TODO(synk): fold the k*k taps into the matmul K grid axis (BlockSpec
    # index_map over the padded NHWC input) instead of materializing the
    # k*k-expanded patch matrix in HBM.
    patches = [xp[:, kh:kh + stride * OH:stride, kw:kw + stride * OW:stride, :]
               for kh in range(k) for kw in range(k)]
    pmat = jnp.concatenate(patches, axis=-1).reshape(N * OH * OW, k * k * C)
    out = pallas_matmul(pmat, wmat)
    return out.reshape(N, OH, OW, O)


@functools.partial(jax.jit,
                   static_argnames=("k", "stride", "padding", "output_padding"))
def conv_transpose2d(x, wmat, *, k, stride=1, padding=0, output_padding=0):
    """x: NHWC; wmat is the pre-flipped/transposed effective conv matrix."""
    N, H, W, C = x.shape
    if stride > 1:
        Hd, Wd = (H - 1) * stride + 1, (W - 1) * stride + 1
        xd = jnp.zeros((N, Hd, Wd, C), x.dtype).at[:, ::stride, ::stride, :].set(x)
    else:
        xd = x
    lo = k - 1 - padding
    hi = k - 1 - padding + output_padding
    xp = jnp.pad(xd, ((0, 0), (lo, hi), (lo, hi), (0, 0)))
    return conv2d(xp, wmat, k=k, stride=1, padding=0)


@functools.partial(jax.jit, static_argnames=("k", "stride", "padding"))
def maxpool2d(x, *, k=3, stride=2, padding=1):
    """3x3/s2 max pool as an XLA-fused max tree (no 9x stacked HBM copy)."""
    N, H, W, C = x.shape
    neg = jnp.finfo(x.dtype).min
    xp = jnp.pad(x, ((0, 0), (padding, padding), (padding, padding), (0, 0)),
                 constant_values=neg)
    OH = (H + 2 * padding - k) // stride + 1
    OW = (W + 2 * padding - k) // stride + 1
    out = None
    for kh in range(k):
        for kw in range(k):
            v = xp[:, kh:kh + stride * OH:stride, kw:kw + stride * OW:stride, :]
            out = v if out is None else jnp.maximum(out, v)
    return out


# ----------------------------------------------------------------------------
# Deterministic parameter initialization (weights pre-laid-out for the MXU)
# ----------------------------------------------------------------------------

_BASE_KEY = jax.random.PRNGKey(42)
_KCOUNT = [0]


def _next_key():
    _KCOUNT[0] += 1
    return jax.random.fold_in(_BASE_KEY, _KCOUNT[0])


def conv_w(out_c, in_c, k):
    """Conv2d weight pre-laid-out as a (k*k*in_c, out_c) bf16 matmul matrix."""
    fan_in = in_c * k * k
    w = (jax.random.normal(_next_key(), (out_c, in_c, k, k), jnp.float32)
         / np.sqrt(fan_in))
    return (jnp.transpose(w, (2, 3, 1, 0))
            .reshape(k * k * in_c, out_c).astype(jnp.bfloat16))


def convT_w(in_c, out_c, k):
    """ConvTranspose2d weight pre-flipped/transposed to the effective conv
    matmul matrix (k*k*in_c, out_c) bf16 (transpose conv = dilate + pad +
    flipped-kernel conv)."""
    fan_in = in_c * k * k
    w = (jax.random.normal(_next_key(), (in_c, out_c, k, k), jnp.float32)
         / np.sqrt(fan_in))
    w_eff = jnp.transpose(jnp.flip(w, axis=(2, 3)), (1, 0, 2, 3))  # (O, I, k, k)
    return (jnp.transpose(w_eff, (2, 3, 1, 0))
            .reshape(k * k * in_c, out_c).astype(jnp.bfloat16))


def bn_p(c):
    return (jnp.ones((c,), jnp.float32), jnp.zeros((c,), jnp.float32))


# ----------------------------------------------------------------------------
# Blocks
# ----------------------------------------------------------------------------

DOWN_EXPANSION = 4  # standard ResNet Bottleneck expansion


def make_bottleneck(in_c, mid_c, stride=1, downsample=False):
    p = {
        "stride": stride,
        "conv1": conv_w(mid_c, in_c, 1), "bn1": bn_p(mid_c),
        "conv2": conv_w(mid_c, mid_c, 3), "bn2": bn_p(mid_c),
        "conv3": conv_w(mid_c * DOWN_EXPANSION, mid_c, 1),
        "bn3": bn_p(mid_c * DOWN_EXPANSION),
    }
    if downsample:
        p["down_conv"] = conv_w(mid_c * DOWN_EXPANSION, in_c, 1)
        p["down_bn"] = bn_p(mid_c * DOWN_EXPANSION)
    return p


def bottleneck_fwd(p, x):
    out = conv2d(x, p["conv1"], k=1)
    out = batchnorm_act(out, *p["bn1"], relu=True)
    out = conv2d(out, p["conv2"], k=3, stride=p["stride"], padding=1)
    out = batchnorm_act(out, *p["bn2"], relu=True)
    out = conv2d(out, p["conv3"], k=1)
    if "down_conv" in p:
        sc = conv2d(x, p["down_conv"], k=1, stride=p["stride"])
        sc = batchnorm_act(sc, *p["down_bn"], relu=False)
    else:
        sc = x
    # bn3 (no ReLU) + residual add + ReLU fused into a single Pallas pass.
    return batchnorm_add_relu(out, *p["bn3"], residual=sc, relu_before_add=False)


def make_deconv_bottleneck(in_c, mid_c, expansion, stride=1, upsample=False):
    p = {
        "stride": stride, "expansion": expansion,
        "conv1": conv_w(mid_c, in_c, 1), "bn1": bn_p(mid_c),
        "bn2": bn_p(mid_c),
        "conv3": conv_w(mid_c * expansion, mid_c, 1),
        "bn3": bn_p(mid_c * expansion),
    }
    if stride == 1:
        p["conv2"] = conv_w(mid_c, mid_c, 3)       # regular 3x3 conv
    else:
        p["conv2_t"] = convT_w(mid_c, mid_c, 3)    # 3x3 transpose conv
    if upsample:
        up_out = mid_c * expansion
        p["up_conv"] = convT_w(in_c, up_out, 1)    # 1x1 transpose conv, stride
        p["up_bn"] = bn_p(up_out)
    return p


def deconv_bottleneck_fwd(p, x):
    out = conv2d(x, p["conv1"], k=1)
    out = batchnorm_act(out, *p["bn1"], relu=True)
    if p["stride"] == 1:
        out = conv2d(out, p["conv2"], k=3, stride=1, padding=1)
    else:
        out = conv_transpose2d(out, p["conv2_t"], k=3, stride=p["stride"],
                               padding=1, output_padding=1)
    out = batchnorm_act(out, *p["bn2"], relu=True)
    out = conv2d(out, p["conv3"], k=1)
    if "up_conv" in p:
        sc = conv_transpose2d(x, p["up_conv"], k=1, stride=p["stride"],
                              padding=0, output_padding=1)
        sc = batchnorm_act(sc, *p["up_bn"], relu=False)
    else:
        sc = x
    # Reference DeconvBottleneck applies ReLU to bn3 BEFORE the add, then
    # ReLU again after the add -- both fused into one Pallas pass here.
    return batchnorm_add_relu(out, *p["bn3"], residual=sc, relu_before_add=True)


# ----------------------------------------------------------------------------
# DDN model
# ----------------------------------------------------------------------------

def make_ddn_params(num_layers):
    P = {}
    in_c = [64]
    P["conv1"] = conv_w(64, 1, 7)
    P["bn1"] = bn_p(64)

    def make_downlayer(init_c, n, stride=1):
        layers = []
        need_ds = (stride != 1) or (in_c[0] != init_c * DOWN_EXPANSION)
        layers.append(make_bottleneck(in_c[0], init_c, stride, need_ds))
        in_c[0] = init_c * DOWN_EXPANSION
        for _ in range(1, n):
            layers.append(make_bottleneck(in_c[0], init_c, 1, False))
        return layers

    def make_up_block(init_c, n, stride=1):
        layers = []
        need_us = (stride != 1) or (in_c[0] != init_c * 2)
        for _ in range(1, n):
            layers.append(make_deconv_bottleneck(in_c[0], init_c, 4, 1, False))
        layers.append(make_deconv_bottleneck(in_c[0], init_c, 2, stride, need_us))
        in_c[0] = init_c * 2
        return layers

    P["layer1"] = make_downlayer(64, num_layers[0])
    P["layer2"] = make_downlayer(128, num_layers[1], 2)
    P["layer3"] = make_downlayer(256, num_layers[2], 2)
    P["layer4"] = make_downlayer(512, num_layers[3], 2)
    P["uplayer1"] = make_up_block(512, num_layers[3], 2)
    P["uplayer2"] = make_up_block(256, num_layers[2], 2)
    P["uplayer3"] = make_up_block(128, num_layers[1], 2)
    P["uplayer4"] = make_up_block(64, num_layers[0], 2)
    # uplayer_top: DeconvBottleneck(in_c, 64, expansion=1, stride=2, upsample)
    P["uplayer_top"] = make_deconv_bottleneck(in_c[0], 64, 1, 2, True)
    # conv1_1: ConvTranspose2d(64, 1, kernel_size=1, stride=1, bias=False)
    P["conv1_1"] = convT_w(64, 1, 1)
    return P


def ddn_forward(P, x_nchw):
    x = jnp.transpose(x_nchw, (0, 2, 3, 1)).astype(jnp.float32)  # NCHW -> NHWC

    # encoder
    out = conv2d(x, P["conv1"], k=7, stride=2, padding=3)
    out = batchnorm_act(out, *P["bn1"], relu=True)
    out = maxpool2d(out, k=3, stride=2, padding=1)
    for blk in P["layer1"]:
        out = bottleneck_fwd(blk, out)
    for blk in P["layer2"]:
        out = bottleneck_fwd(blk, out)
    for blk in P["layer3"]:
        out = bottleneck_fwd(blk, out)
    for blk in P["layer4"]:
        out = bottleneck_fwd(blk, out)
    tmp1 = out

    # decoder
    for blk in P["uplayer1"]:
        out = deconv_bottleneck_fwd(blk, out)
    for blk in P["uplayer2"]:
        out = deconv_bottleneck_fwd(blk, out)
    for blk in P["uplayer3"]:
        out = deconv_bottleneck_fwd(blk, out)
    for blk in P["uplayer4"]:
        out = deconv_bottleneck_fwd(blk, out)
    out = deconv_bottleneck_fwd(P["uplayer_top"], out)
    pred = conv_transpose2d(out, P["conv1_1"], k=1, stride=1, padding=0,
                            output_padding=0)

    tmp1_nchw = jnp.transpose(tmp1, (0, 3, 1, 2)).astype(jnp.float32)
    pred_nchw = jnp.transpose(pred, (0, 3, 1, 2)).astype(jnp.float32)
    return tmp1_nchw, pred_nchw


# ----------------------------------------------------------------------------

if __name__ == "__main__":
    num_layers = [1, 1, 1, 1]            # small but structurally faithful DDN
    params = make_ddn_params(num_layers)

    x = jax.random.normal(jax.random.PRNGKey(0), (2, 1, 32, 32), jnp.float32)

    tmp1, pred = ddn_forward(params, x)
    jax.block_until_ready((tmp1, pred))

    assert tmp1.shape == (2, 2048, 1, 1), tmp1.shape    # encoder bottleneck
    assert pred.shape == (2, 1, 32, 32), pred.shape     # decoded prediction
    assert bool(jnp.all(jnp.isfinite(tmp1))) and bool(jnp.all(jnp.isfinite(pred)))
    print("KERNEL_OK")
</pallas_src>

<mosaic_0001>
module attributes {stable_mosaic.version = 11 : i64} {
  func.func @_matmul_single_kernel(%arg0: memref<512x49xbf16, #tpu.memory_space<vmem>>, %arg1: memref<49x64xbf16, #tpu.memory_space<vmem>>, %arg2: memref<512x64xf32, #tpu.memory_space<vmem>>) attributes {dimension_semantics = [], scalar_prefetch = 0 : i64, scratch_operands = 0 : i64, tpu.core_type = #tpu.core_type<tc>} {
    %c0 = arith.constant 0 : index
    %c0_0 = arith.constant 0 : index
    %0 = vector.load %arg0[%c0, %c0_0] : memref<512x49xbf16, #tpu.memory_space<vmem>>, vector<512x49xbf16>
    %c0_1 = arith.constant 0 : index
    %c0_2 = arith.constant 0 : index
    %1 = vector.load %arg1[%c0_1, %c0_2] : memref<49x64xbf16, #tpu.memory_space<vmem>>, vector<49x64xbf16>
    %cst = arith.constant dense<0.000000e+00> : vector<512x64xf32>
    %2 = tpu.matmul %0, %1, %cst {dimension_numbers = #tpu.dot_dimension_numbers<[1], [0], [0], [1], [0, 0, 1, 1], [], []>} : vector<512x49xbf16>, vector<49x64xbf16>, vector<512x64xf32> -> vector<512x64xf32>
    %c0_3 = arith.constant 0 : index
    %c0_4 = arith.constant 0 : index
    %3 = vector.load %arg2[%c0_3, %c0_4] : memref<512x64xf32, #tpu.memory_space<vmem>>, vector<512x64xf32>
    tpu.vector_store %arg2[%c0_3, %c0_4], %2 {strides = array<i32>} : memref<512x64xf32, #tpu.memory_space<vmem>>, vector<512x64xf32>,
    return
  }
}

</mosaic_0001>

<bundles_post_ra>
// kernel: conv2d.1
= control target key start
LH: loop header
LB: loop body
LE: loop exit
PB: predicated region body
PF: predicated region fallthrough
CT: control target
= control target key end

     0   :  { %vm362_vm0 = vcmask 1040384   ;;  %v984_v1 = vmov 0   ;;  %vm265_vm1 = vcmask 400384   ;;  %s1210_s0 = inlined_call_operand.vmem [shape: bf16[512,49], index: 0, kind: input, shape index: {}]   ;;  %s1211_s1 = inlined_call_operand.vmem [shape: bf16[49,64], index: 1, kind: input, shape index: {}]   ;;  %s1212_s2 = inlined_call_operand.hbm [shape: f32[512,64], index: 2, kind: output, shape index: {}]  }
   0x1   :  { %v926_v0 = vld [vmem:[%s1211_s1 + $0x18] ss:$0 sps:$4 sm:$0x11]   ;;  %v364_v2 = vsel %vm362_vm0, 65535, %v984_v1  ;;  %v927_v4 = vld [vmem:[%s1211_s1 + $0x10] sm:$0xff]   ;;  %v930_v5 = vld [vmem:[%s1210_s0] sm:$0xff]  }
   0x2   :  { %v366_v3 = vand.u32 %v926_v0, %v364_v2  ;;  %v931_v6 = vld [vmem:[%s1210_s0 + $0x80] sm:$0xff]   ;;  %v928_v7 = vld [vmem:[%s1211_s1 + $0x8] sm:$0xff]   ;;  %850 = vmatprep.mubr.msk.bf16.mxu0 %vm265_vm1, %v930_v5  ;;  %v934_v11 = vld [vmem:[%s1210_s0 + $0x10] sm:$0xff]  }
   0x3   :  { %882 = vmatprep.mubr.msk.bf16.mxu1 %vm265_vm1, %v931_v6  ;;  %v929_v8 = vld [vmem:[%s1211_s1] sm:$0xff]   ;;  %v932_v9 = vld [vmem:[%s1210_s0 + $0x8] sm:$0xff]   ;;  %v935_v12 = vld [vmem:[%s1210_s0 + $0x90] sm:$0xff]  }
   0x4   :  { %842 = vmatprep.subr.bf16.mxu0 %v366_v3  ;;  %914 = vmatprep.subr.bf16.mxu1 %v366_v3  ;;  %v933_v10 = vld [vmem:[%s1210_s0 + $0x88] sm:$0xff]   ;;  %v936_v13 = vld [vmem:[%s1210_s0 + $0x18] sm:$0xff]   ;;  %v938_v15 = vld [vmem:[%s1210_s0 + $0x20] sm:$0xff]  }
   0x5   :  { %843 = vmatpush3.bf16.msra.mxu0 %v366_v3  ;;  %918 = vmatpush3.bf16.msra.mxu1 %v366_v3  ;;  %v937_v14 = vld [vmem:[%s1210_s0 + $0x98] sm:$0xff]   ;;  %v939_v16 = vld [vmem:[%s1210_s0 + $0xa0] sm:$0xff]   ;;  %v940_v17 = vld [vmem:[%s1210_s0 + $0x28] sm:$0xff]  }
   0x6   :  { %844 = vmatprep.subr.bf16.mxu0 %v927_v4  ;;  %915 = vmatprep.subr.bf16.mxu1 %v927_v4  ;;  %v941_v18 = vld [vmem:[%s1210_s0 + $0xa8] sm:$0xff]   ;;  %v942_v19 = vld [vmem:[%s1210_s0 + $0x30] sm:$0xff]  }
   0x7   :  { %v943_v20 = vld [vmem:[%s1210_s0 + $0xb0] sm:$0xff]  }
   0x9   :  { %845 = vmatpush3.bf16.msra.mxu0 %v927_v4  ;;  %919 = vmatpush3.bf16.msra.mxu1 %v927_v4 }
   0xa   :  { %846 = vmatprep.subr.bf16.mxu0 %v928_v7  ;;  %916 = vmatprep.subr.bf16.mxu1 %v928_v7 }
   0xd   :  { %847 = vmatpush3.bf16.msra.mxu0 %v928_v7  ;;  %920 = vmatpush3.bf16.msra.mxu1 %v928_v7 }
   0xe   :  { %848 = vmatprep.subr.bf16.mxu0 %v929_v8  ;;  %917 = vmatprep.subr.bf16.mxu1 %v929_v8 }
  0x11   :  { %849 = vmatpush3.bf16.msra.mxu0 %v929_v8  ;;  %921 = vmatpush3.bf16.msra.mxu1 %v929_v8 }
  0x14   :  { %851 = vmatmul.mubr.msk.bf16.vlgmr.msra.gmra.mxu0 %vm265_vm1, %v932_v9  ;;  %883 = vmatmul.mubr.msk.bf16.vlgmr.msra.gmra.mxu1 %vm265_vm1, %v933_v10 }
  0x15   :  { %854 = vmatprep.mubr.msk.bf16.mxu0 %vm265_vm1, %v934_v11  ;;  %886 = vmatprep.mubr.msk.bf16.mxu1 %vm265_vm1, %v935_v12 }
  0x1c   :  { %855 = vmatmul.mubr.msk.bf16.gmra.mxu0 %vm265_vm1, %v936_v13  ;;  %887 = vmatmul.mubr.msk.bf16.gmra.mxu1 %vm265_vm1, %v937_v14 }
  0x1d   :  { %858 = vmatprep.mubr.msk.bf16.mxu0 %vm265_vm1, %v938_v15  ;;  %890 = vmatprep.mubr.msk.bf16.mxu1 %vm265_vm1, %v939_v16 }
  0x1e   :  { %7 = vsyncpa [#allocation3], 0  ;;  %v944_v21 = vld [vmem:[%s1210_s0 + $0x38] sm:$0xff]   ;;  %v946_v23 = vld [vmem:[%s1210_s0 + $0x40] sm:$0xff]   ;;  %vm657_vm2 = vcmask 523264  }
  0x1f   :  { %v945_v22 = vld [vmem:[%s1210_s0 + $0xb8] sm:$0xff]   ;;  %v947_v24 = vld [vmem:[%s1210_s0 + $0xc0] sm:$0xff]   ;;  %v948_v25 = vld [vmem:[%s1210_s0 + $0x48] sm:$0xff]  }
  0x20   :  { %v949_v26 = vld [vmem:[%s1210_s0 + $0xc8] sm:$0xff]   ;;  %v950_v27 = vld [vmem:[%s1210_s0 + $0x50] sm:$0xff]   ;;  %v952_v29 = vld [vmem:[%s1210_s0 + $0x58] sm:$0xff]  }
  0x21   :  { %v951_v28 = vld [vmem:[%s1210_s0 + $0xd0] sm:$0xff]   ;;  %v953_v30 = vld [vmem:[%s1210_s0 + $0xd8] sm:$0xff]   ;;  %v954_v31 = vld [vmem:[%s1210_s0 + $0x60] sm:$0xff]  }
  0x22   :  { %v955_v32 = vld [vmem:[%s1210_s0 + $0xe0] sm:$0xff]   ;;  %v956_v33 = vld [vmem:[%s1210_s0 + $0x68] sm:$0xff]   ;;  %v958_v35 = vld [vmem:[%s1210_s0 + $0x70] sm:$0xff]  }
  0x23   :  { %v957_v34 = vld [vmem:[%s1210_s0 + $0xe8] sm:$0xff]   ;;  %v959_v36 = vld [vmem:[%s1210_s0 + $0xf0] sm:$0xff]   ;;  %v960_v37 = vld [vmem:[%s1210_s0 + $0x78] sm:$0xff]  }
  0x24   :  { %859 = vmatmul.mubr.msk.bf16.gmra.mxu0 %vm265_vm1, %v940_v17  ;;  %891 = vmatmul.mubr.msk.bf16.gmra.mxu1 %vm265_vm1, %v941_v18  ;;  %v961_v38 = vld [vmem:[%s1210_s0 + $0xf8] sm:$0xff]   ;;  %s985_s0 = smov [#allocation2]  }
  0x25   :  { %862 = vmatprep.mubr.msk.bf16.mxu0 %vm265_vm1, %v942_v19  ;;  %894 = vmatprep.mubr.msk.bf16.mxu1 %vm265_vm1, %v943_v20  ;;  %s727_s23 = sshll.u32 %s985_s0, 4  ;;  %s728_s23 = int_to_ptr.vmem [resolvable:$true] %s727_s23 }
  0x26   :  { %s962_s24 = scalar_lea.vmem %s728_s23, 8192  ;;  %p967_p1 = scmp.lt.s32.totalorder %s728_s23, %s728_s23 }
  0x27   :  { %p963_p0 = scmp.ne.s32.totalorder %s728_s23, %s962_s24  ;;  %p968_p2 = scmp.lt.s32.totalorder %s962_s24, %s962_s24 }
  0x29   :  { %p969_p3 = por %p968_p2, %p967_p1 }
  0x2b   :  { %p970_p4 = pnand %p969_p3, %p963_p0 }
  0x2c   :  { %863 = vmatmul.mubr.msk.bf16.gmra.mxu0 %vm265_vm1, %v944_v21  ;;  %895 = vmatmul.mubr.msk.bf16.gmra.mxu1 %vm265_vm1, %v945_v22 }
  0x2d   :  { %866 = vmatprep.mubr.msk.bf16.mxu0 %vm265_vm1, %v946_v23  ;;  %898 = vmatprep.mubr.msk.bf16.mxu1 %vm265_vm1, %v947_v24 }
  0x34   :  { %867 = vmatmul.mubr.msk.bf16.gmra.mxu0 %vm265_vm1, %v948_v25  ;;  %899 = vmatmul.mubr.msk.bf16.gmra.mxu1 %vm265_vm1, %v949_v26 }
  0x35   :  { %870 = vmatprep.mubr.msk.bf16.mxu0 %vm265_vm1, %v950_v27  ;;  %902 = vmatprep.mubr.msk.bf16.mxu1 %vm265_vm1, %v951_v28 }
  0x3c   :  { %871 = vmatmul.mubr.msk.bf16.gmra.mxu0 %vm265_vm1, %v952_v29  ;;  %903 = vmatmul.mubr.msk.bf16.gmra.mxu1 %vm265_vm1, %v953_v30 }
  0x3d   :  { %874 = vmatprep.mubr.msk.bf16.mxu0 %vm265_vm1, %v954_v31  ;;  %906 = vmatprep.mubr.msk.bf16.mxu1 %vm265_vm1, %v955_v32 }
  0x44   :  { %875 = vmatmul.mubr.msk.bf16.gmra.mxu0 %vm265_vm1, %v956_v33  ;;  %907 = vmatmul.mubr.msk.bf16.gmra.mxu1 %vm265_vm1, %v957_v34 }
  0x45   :  { %878 = vmatprep.mubr.msk.bf16.mxu0 %vm265_vm1, %v958_v35  ;;  %910 = vmatprep.mubr.msk.bf16.mxu1 %vm265_vm1, %v959_v36 }
  0x4c   :  { %879 = vmatmul.mubr.msk.bf16.gmra.mxu0 %vm265_vm1, %v960_v37  ;;  %911 = vmatmul.mubr.msk.bf16.gmra.mxu1 %vm265_vm1, %v961_v38 }
  0xd4   :  { %v852_v39 = vpop.f32.mrf.mxu0  ;;  %v884_v40 = vpop.f32.mrf.mxu1 }
  0xd5   :  { %660 = vst.msk [vmem:[#allocation2 + $0x10] sm:$0xff] %vm657_vm2, %v852_v39  ;;  %692 = vst.msk [vmem:[#allocation2 + $0x110] sm:$0xff] %vm657_vm2, %v884_v40 }
  0xd6   :  { %v402_v41 = vpop.f32.mrf.mxu0  ;;  %v530_v42 = vpop.f32.mrf.mxu1 }
  0xd7   :  { %658 = vst.msk [vmem:[#allocation2] sm:$0xff] %vm657_vm2, %v402_v41  ;;  %690 = vst.msk [vmem:[#allocation2 + $0x100] sm:$0xff] %vm657_vm2, %v530_v42 }
  0xd8   :  { %v853_v43 = vpop.f32.mrf.mxu0  ;;  %v885_v44 = vpop.f32.mrf.mxu1 }
  0xd9   :  { %661 = vst.msk [vmem:[#allocation2 + $0x18] sm:$0xff] %vm657_vm2, %v853_v43  ;;  %693 = vst.msk [vmem:[#allocation2 + $0x118] sm:$0xff] %vm657_vm2, %v885_v44 }
  0xda   :  { %v405_v45 = vpop.f32.mrf.mxu0  ;;  %v533_v46 = vpop.f32.mrf.mxu1 }
  0xdb   :  { %659 = vst.msk [vmem:[#allocation2 + $0x8] sm:$0xff] %vm657_vm2, %v405_v45  ;;  %691 = vst.msk [vmem:[#allocation2 + $0x108] sm:$0xff] %vm657_vm2, %v533_v46 }
  0xdc   :  { %v856_v47 = vpop.f32.mrf.mxu0  ;;  %v888_v48 = vpop.f32.mrf.mxu1 }
  0xdd   :  { %664 = vst.msk [vmem:[#allocation2 + $0x30] sm:$0xff] %vm657_vm2, %v856_v47  ;;  %696 = vst.msk [vmem:[#allocation2 + $0x130] sm:$0xff] %vm657_vm2, %v888_v48 }
  0xde   :  { %v418_v49 = vpop.f32.mrf.mxu0  ;;  %v546_v50 = vpop.f32.mrf.mxu1 }
  0xdf   :  { %662 = vst.msk [vmem:[#allocation2 + $0x20] sm:$0xff] %vm657_vm2, %v418_v49  ;;  %694 = vst.msk [vmem:[#allocation2 + $0x120] sm:$0xff] %vm657_vm2, %v546_v50 }
  0xe0   :  { %v857_v51 = vpop.f32.mrf.mxu0  ;;  %v889_v52 = vpop.f32.mrf.mxu1 }
  0xe1   :  { %665 = vst.msk [vmem:[#allocation2 + $0x38] sm:$0xff] %vm657_vm2, %v857_v51  ;;  %697 = vst.msk [vmem:[#allocation2 + $0x138] sm:$0xff] %vm657_vm2, %v889_v52 }
  0xe2   :  { %v421_v53 = vpop.f32.mrf.mxu0  ;;  %v549_v54 = vpop.f32.mrf.mxu1 }
  0xe3   :  { %663 = vst.msk [vmem:[#allocation2 + $0x28] sm:$0xff] %vm657_vm2, %v421_v53  ;;  %695 = vst.msk [vmem:[#allocation2 + $0x128] sm:$0xff] %vm657_vm2, %v549_v54 }
  0xe4   :  { %v860_v55 = vpop.f32.mrf.mxu0  ;;  %v892_v56 = vpop.f32.mrf.mxu1 }
  0xe5   :  { %668 = vst.msk [vmem:[#allocation2 + $0x50] sm:$0xff] %vm657_vm2, %v860_v55  ;;  %700 = vst.msk [vmem:[#allocation2 + $0x150] sm:$0xff] %vm657_vm2, %v892_v56 }
  0xe6   :  { %v434_v57 = vpop.f32.mrf.mxu0  ;;  %v562_v58 = vpop.f32.mrf.mxu1 }
  0xe7   :  { %666 = vst.msk [vmem:[#allocation2 + $0x40] sm:$0xff] %vm657_vm2, %v434_v57  ;;  %698 = vst.msk [vmem:[#allocation2 + $0x140] sm:$0xff] %vm657_vm2, %v562_v58 }
  0xe8   :  { %v861_v59 = vpop.f32.mrf.mxu0  ;;  %v893_v60 = vpop.f32.mrf.mxu1 }
  0xe9   :  { %669 = vst.msk [vmem:[#allocation2 + $0x58] sm:$0xff] %vm657_vm2, %v861_v59  ;;  %701 = vst.msk [vmem:[#allocation2 + $0x158] sm:$0xff] %vm657_vm2, %v893_v60 }
  0xea   :  { %v437_v61 = vpop.f32.mrf.mxu0  ;;  %v565_v62 = vpop.f32.mrf.mxu1 }
  0xeb   :  { %667 = vst.msk [vmem:[#allocation2 + $0x48] sm:$0xff] %vm657_vm2, %v437_v61  ;;  %699 = vst.msk [vmem:[#allocation2 + $0x148] sm:$0xff] %vm657_vm2, %v565_v62 }
  0xec   :  { %v864_v63 = vpop.f32.mrf.mxu0  ;;  %v896_v0 = vpop.f32.mrf.mxu1 }
  0xed   :  { %672 = vst.msk [vmem:[#allocation2 + $0x70] sm:$0xff] %vm657_vm2, %v864_v63  ;;  %704 = vst.msk [vmem:[#allocation2 + $0x170] sm:$0xff] %vm657_vm2, %v896_v0 }
  0xee   :  { %v450_v1 = vpop.f32.mrf.mxu0  ;;  %v578_v2 = vpop.f32.mrf.mxu1 }
  0xef   :  { %670 = vst.msk [vmem:[#allocation2 + $0x60] sm:$0xff] %vm657_vm2, %v450_v1  ;;  %702 = vst.msk [vmem:[#allocation2 + $0x160] sm:$0xff] %vm657_vm2, %v578_v2 }
  0xf0   :  { %v865_v3 = vpop.f32.mrf.mxu0  ;;  %v897_v4 = vpop.f32.mrf.mxu1 }
  0xf1   :  { %673 = vst.msk [vmem:[#allocation2 + $0x78] sm:$0xff] %vm657_vm2, %v865_v3  ;;  %705 = vst.msk [vmem:[#allocation2 + $0x178] sm:$0xff] %vm657_vm2, %v897_v4 }
  0xf2   :  { %v453_v5 = vpop.f32.mrf.mxu0  ;;  %v581_v6 = vpop.f32.mrf.mxu1 }
  0xf3   :  { %671 = vst.msk [vmem:[#allocation2 + $0x68] sm:$0xff] %vm657_vm2, %v453_v5  ;;  %703 = vst.msk [vmem:[#allocation2 + $0x168] sm:$0xff] %vm657_vm2, %v581_v6 }
  0xf4   :  { %v868_v7 = vpop.f32.mrf.mxu0  ;;  %v900_v8 = vpop.f32.mrf.mxu1 }
  0xf5   :  { %676 = vst.msk [vmem:[#allocation2 + $0x90] sm:$0xff] %vm657_vm2, %v868_v7  ;;  %708 = vst.msk [vmem:[#allocation2 + $0x190] sm:$0xff] %vm657_vm2, %v900_v8 }
  0xf6   :  { %v466_v9 = vpop.f32.mrf.mxu0  ;;  %v594_v10 = vpop.f32.mrf.mxu1 }
  0xf7   :  { %674 = vst.msk [vmem:[#allocation2 + $0x80] sm:$0xff] %vm657_vm2, %v466_v9  ;;  %706 = vst.msk [vmem:[#allocation2 + $0x180] sm:$0xff] %vm657_vm2, %v594_v10 }
  0xf8   :  { %v869_v11 = vpop.f32.mrf.mxu0  ;;  %v901_v12 = vpop.f32.mrf.mxu1 }
  0xf9   :  { %677 = vst.msk [vmem:[#allocation2 + $0x98] sm:$0xff] %vm657_vm2, %v869_v11  ;;  %709 = vst.msk [vmem:[#allocation2 + $0x198] sm:$0xff] %vm657_vm2, %v901_v12 }
  0xfa   :  { %v469_v13 = vpop.f32.mrf.mxu0  ;;  %v597_v14 = vpop.f32.mrf.mxu1 }
  0xfb   :  { %675 = vst.msk [vmem:[#allocation2 + $0x88] sm:$0xff] %vm657_vm2, %v469_v13  ;;  %707 = vst.msk [vmem:[#allocation2 + $0x188] sm:$0xff] %vm657_vm2, %v597_v14 }
  0xfc   :  { %v872_v15 = vpop.f32.mrf.mxu0  ;;  %v904_v16 = vpop.f32.mrf.mxu1 }
  0xfd   :  { %680 = vst.msk [vmem:[#allocation2 + $0xb0] sm:$0xff] %vm657_vm2, %v872_v15  ;;  %712 = vst.msk [vmem:[#allocation2 + $0x1b0] sm:$0xff] %vm657_vm2, %v904_v16 }
  0xfe   :  { %v482_v17 = vpop.f32.mrf.mxu0  ;;  %v610_v18 = vpop.f32.mrf.mxu1 }
  0xff   :  { %678 = vst.msk [vmem:[#allocation2 + $0xa0] sm:$0xff] %vm657_vm2, %v482_v17  ;;  %710 = vst.msk [vmem:[#allocation2 + $0x1a0] sm:$0xff] %vm657_vm2, %v610_v18 }
 0x100   :  { %v873_v19 = vpop.f32.mrf.mxu0  ;;  %v905_v20 = vpop.f32.mrf.mxu1 }
 0x101   :  { %681 = vst.msk [vmem:[#allocation2 + $0xb8] sm:$0xff] %vm657_vm2, %v873_v19  ;;  %713 = vst.msk [vmem:[#allocation2 + $0x1b8] sm:$0xff] %vm657_vm2, %v905_v20 }
 0x102   :  { %v485_v21 = vpop.f32.mrf.mxu0  ;;  %v613_v22 = vpop.f32.mrf.mxu1 }
 0x103   :  { %679 = vst.msk [vmem:[#allocation2 + $0xa8] sm:$0xff] %vm657_vm2, %v485_v21  ;;  %711 = vst.msk [vmem:[#allocation2 + $0x1a8] sm:$0xff] %vm657_vm2, %v613_v22 }
 0x104   :  { %v876_v23 = vpop.f32.mrf.mxu0  ;;  %v908_v24 = vpop.f32.mrf.mxu1 }
 0x105   :  { %684 = vst.msk [vmem:[#allocation2 + $0xd0] sm:$0xff] %vm657_vm2, %v876_v23  ;;  %716 = vst.msk [vmem:[#allocation2 + $0x1d0] sm:$0xff] %vm657_vm2, %v908_v24 }
 0x106   :  { %v498_v25 = vpop.f32.mrf.mxu0  ;;  %v626_v26 = vpop.f32.mrf.mxu1 }
 0x107   :  { %682 = vst.msk [vmem:[#allocation2 + $0xc0] sm:$0xff] %vm657_vm2, %v498_v25  ;;  %714 = vst.msk [vmem:[#allocation2 + $0x1c0] sm:$0xff] %vm657_vm2, %v626_v26 }
 0x108   :  { %v877_v27 = vpop.f32.mrf.mxu0  ;;  %v909_v28 = vpop.f32.mrf.mxu1 }
 0x109   :  { %685 = vst.msk [vmem:[#allocation2 + $0xd8] sm:$0xff] %vm657_vm2, %v877_v27  ;;  %717 = vst.msk [vmem:[#allocation2 + $0x1d8] sm:$0xff] %vm657_vm2, %v909_v28 }
 0x10a   :  { %v501_v29 = vpop.f32.mrf.mxu0  ;;  %v629_v30 = vpop.f32.mrf.mxu1 }
 0x10b   :  { %683 = vst.msk [vmem:[#allocation2 + $0xc8] sm:$0xff] %vm657_vm2, %v501_v29  ;;  %715 = vst.msk [vmem:[#allocation2 + $0x1c8] sm:$0xff] %vm657_vm2, %v629_v30 }
 0x10c   :  { %v880_v31 = vpop.f32.mrf.mxu0  ;;  %v912_v32 = vpop.f32.mrf.mxu1 }
 0x10d   :  { %688 = vst.msk [vmem:[#allocation2 + $0xf0] sm:$0xff] %vm657_vm2, %v880_v31  ;;  %720 = vst.msk [vmem:[#allocation2 + $0x1f0] sm:$0xff] %vm657_vm2, %v912_v32 }
 0x10e   :  { %v514_v33 = vpop.f32.mrf.mxu0  ;;  %v642_v34 = vpop.f32.mrf.mxu1 }
 0x10f   :  { %686 = vst.msk [vmem:[#allocation2 + $0xe0] sm:$0xff] %vm657_vm2, %v514_v33  ;;  %718 = vst.msk [vmem:[#allocation2 + $0x1e0] sm:$0xff] %vm657_vm2, %v642_v34 }
 0x110   :  { %v881_v35 = vpop.f32.mrf.mxu0  ;;  %v913_v36 = vpop.f32.mrf.mxu1 }
 0x111   :  { %689 = vst.msk [vmem:[#allocation2 + $0xf8] sm:$0xff] %vm657_vm2, %v881_v35  ;;  %721 = vst.msk [vmem:[#allocation2 + $0x1f8] sm:$0xff] %vm657_vm2, %v913_v36 }
 0x112   :  { %v517_v37 = vpop.f32.mrf.mxu0  ;;  %v645_v38 = vpop.f32.mrf.mxu1 }
 0x113   :  { %687 = vst.msk [vmem:[#allocation2 + $0xe8] sm:$0xff] %vm657_vm2, %v517_v37  ;;  %719 = vst.msk [vmem:[#allocation2 + $0x1e8] sm:$0xff] %vm657_vm2, %v645_v38 }
 0x114   :  { %973 = shalt.err (!%p970_p4)
}
 0x115   :  { %s986_s25 = smov 128   ;;  %s987_s26 = smov 8  }
 0x116   :  { %733 = dma.vmem_to_hbm [thread:$0]  %s728_s23, 8192, %s1212_s2, [#allocation3], %s986_s25, %s986_s25, %s987_s26  }
 0x117   :  { %982 = dma.done.wait [#allocation3], 8192  }
 0x118   :  { %983 = vsyncadd [#allocation3], 4294959104 }
 0x119   :  { %737 = vsyncpa [#allocation3], 1 }

</bundles_post_ra>
